<compile_context>
chip_gen: v7x
topology: tpu7x:2x2x1
jax: 0.10.0
libtpu: 0.0.40
codegen_flags: <defaults>
</compile_context>

<pallas_src>
import functools

import jax
import jax.numpy as jnp
from jax.experimental import pallas as pl
from jax.experimental.pallas import tpu as pltpu

_LANES = 128


def _h_swish_kernel(x_ref, o_ref):
    x = x_ref[...]
    # h_sigmoid(x) = relu6(x + 3) / 6 ; h_swish(x) = x * h_sigmoid(x)
    hs = jnp.clip(x + 3.0, 0.0, 6.0) / 6.0
    o_ref[...] = (x * hs).astype(o_ref.dtype)


def _round_up(v: int, m: int) -> int:
    return ((v + m - 1) // m) * m


def _row_multiple(dtype) -> int:
    # sublane packing: f32 -> 8 rows/vreg, bf16 -> 16, int8/fp8 -> 32
    itemsize = jnp.dtype(dtype).itemsize
    if itemsize >= 4:
        return 8
    if itemsize == 2:
        return 16
    return 32


@functools.lru_cache(maxsize=1)
def _target_block_bytes() -> int:
    """Per-block byte budget, tuned per TPU generation (HBM BW vs ~0.35us/step)."""
    try:
        kind = jax.devices()[0].device_kind.lower()
    except Exception:  # be robust to odd backends / CPU fallback
        kind = ""
    if "v7" in kind or "7x" in kind:
        return 8 << 20   # ~3.2 TB/s HBM: large blocks keep step overhead <~8%
    return 4 << 20       # v5e (~0.82 TB/s) / v6e (~1.4 TB/s): 4 MiB is plenty


def _run_2d(x2d: jax.Array, donate: bool = False) -> jax.Array:
    rows, lanes = x2d.shape
    dtype = x2d.dtype
    itemsize = jnp.dtype(dtype).itemsize
    mult = _row_multiple(dtype)
    rows_up = _round_up(rows, mult)

    # Block rows from a generation-aware byte budget; keep it a multiple of the
    # sublane packing so the (8,128) tiling constraint is met.
    br = _target_block_bytes() // (lanes * itemsize)
    br = max(mult, (br // mult) * mult)

    if br >= rows_up:
        # Whole array fits in one block: split into >= 4 grid steps (>= 2 per
        # TensorCore on v7x) so step i+1's input DMA overlaps step i's
        # writeback, subject to a ~512 KiB block floor where splitting stops
        # paying (per-step overhead would dominate).
        floor_rows = _round_up(max(mult, (512 * 1024) // (lanes * itemsize)), mult)
        quarter = _round_up(pl.cdiv(rows, 4), mult)
        br = max(floor_rows, quarter)
    br = min(br, rows_up)

    grid = (pl.cdiv(rows, br),)  # partial last block is masked by Pallas

    block_bytes = br * lanes * itemsize
    # in + out, double-buffered = 4x block bytes, plus headroom.  No artificial
    # clamp: with an 8 MiB block this is ~34 MiB, well within v7x's 64 MiB
    # physical VMEM and v5e/v6e's 128 MiB.
    vmem_limit = max(4 * block_bytes + (2 << 20), 4 << 20)

    return pl.pallas_call(
        _h_swish_kernel,
        out_shape=jax.ShapeDtypeStruct((rows, lanes), dtype),
        grid_spec=pltpu.PrefetchScalarGridSpec(
            num_scalar_prefetch=0,
            grid=grid,
            in_specs=[pl.BlockSpec((br, lanes), lambda i: (i, 0))],
            out_specs=pl.BlockSpec((br, lanes), lambda i: (i, 0)),
        ),
        compiler_params=pltpu.CompilerParams(
            dimension_semantics=("parallel",),
            vmem_limit_bytes=vmem_limit,
        ),
        # Halves HBM footprint when the caller actually donates x (e.g. under
        # jax.jit donate_argnums); traffic is unchanged for this out-of-place op.
        input_output_aliases={0: 0} if donate else {},
    )(x2d)


def h_swish(x: jax.Array, *, donate: bool = False) -> jax.Array:
    """Elementwise h_swish matching PyTorch h_swish.forward: x * relu6(x+3)/6."""
    orig_shape = x.shape
    n = x.size
    flat = x.reshape(-1)

    if n > 0 and n % _LANES == 0:
        # Fast path: only the lane dim (128) has to divide for a no-pad reshape;
        # the row count need not be a multiple of 8 (Pallas masks the partial
        # block).  Exactly one HBM read + one HBM write.
        out2d = _run_2d(flat.reshape(n // _LANES, _LANES), donate=donate)
        return out2d.reshape(orig_shape)

    # Ragged fallback (128 does not divide the element count): pad to a lane
    # multiple, run, drop the tail.
    # TODO(synk): a scalar-prefetched length + masked in-kernel store would
    # avoid the pad/slice HBM passes for large ragged inputs.
    padded = _round_up(max(n, 1), _LANES)
    flat = jnp.pad(flat, (0, padded - n))
    out2d = _run_2d(flat.reshape(padded // _LANES, _LANES))
    return out2d.reshape(-1)[:n].reshape(orig_shape)


if __name__ == "__main__":
    key = jax.random.PRNGKey(0)
    # NCHW input, consistent with PyTorch conventions
    x = jax.random.normal(key, (2, 4, 16, 16), dtype=jnp.float32) * 4.0

    out = jax.block_until_ready(h_swish(x))

    # reference check against plain JAX
    ref = x * (jnp.clip(x + 3.0, 0.0, 6.0) / 6.0)
    assert out.shape == x.shape and out.dtype == x.dtype
    assert jnp.allclose(out, ref, atol=1e-6), "mismatch vs reference"

    # fast path where 128 | n but the row count (n // 128 == 10) is not a
    # multiple of 8 -> exercises the masked partial block
    x2 = jax.random.normal(jax.random.PRNGKey(1), (2, 5, 128), dtype=jnp.float32) * 4.0
    out2 = jax.block_until_ready(h_swish(x2))
    ref2 = x2 * (jnp.clip(x2 + 3.0, 0.0, 6.0) / 6.0)
    assert jnp.allclose(out2, ref2, atol=1e-6), "mismatch vs reference (partial rows)"

    # ragged fallback path (105 elements)
    x3 = jax.random.normal(jax.random.PRNGKey(2), (3, 5, 7), dtype=jnp.float32)
    out3 = jax.block_until_ready(h_swish(x3))
    ref3 = x3 * (jnp.clip(x3 + 3.0, 0.0, 6.0) / 6.0)
    assert jnp.allclose(out3, ref3, atol=1e-6), "mismatch vs reference (ragged)"

    print("KERNEL_OK")
</pallas_src>

<mosaic_0001>
module attributes {stable_mosaic.version = 11 : i64} {
  func.func @_h_swish_kernel(%arg0: i32, %arg1: memref<16x128xf32, #tpu.memory_space<vmem>>, %arg2: memref<16x128xf32, #tpu.memory_space<vmem>>) attributes {dimension_semantics = [#tpu.dimension_semantics<parallel>], iteration_bounds = array<i64: 1>, scalar_prefetch = 0 : i64, scratch_operands = 0 : i64, tpu.core_type = #tpu.core_type<tc>, window_params = [{transform_indices = @transform_0, window_bounds = array<i64: 16, 128>}, {transform_indices = @transform_1, window_bounds = array<i64: 16, 128>}]} {
    %c0 = arith.constant 0 : index
    %c0_0 = arith.constant 0 : index
    %0 = vector.load %arg1[%c0, %c0_0] : memref<16x128xf32, #tpu.memory_space<vmem>>, vector<16x128xf32>
    %cst = arith.constant 3.000000e+00 : f32
    %1 = vector.broadcast %cst : f32 to vector<16x128xf32>
    %2 = arith.addf %0, %1 : vector<16x128xf32>
    %cst_1 = arith.constant 0.000000e+00 : f32
    %cst_2 = arith.constant 6.000000e+00 : f32
    %3 = vector.broadcast %cst_1 : f32 to vector<16x128xf32>
    %4 = arith.maximumf %3, %2 : vector<16x128xf32>
    %5 = vector.broadcast %cst_2 : f32 to vector<16x128xf32>
    %6 = arith.minimumf %5, %4 : vector<16x128xf32>
    %cst_3 = arith.constant 6.000000e+00 : f32
    %7 = vector.broadcast %cst_3 : f32 to vector<16x128xf32>
    %8 = arith.divf %6, %7 : vector<16x128xf32>
    %9 = arith.mulf %0, %8 : vector<16x128xf32>
    %c0_4 = arith.constant 0 : index
    %c0_5 = arith.constant 0 : index
    %10 = vector.load %arg2[%c0_4, %c0_5] : memref<16x128xf32, #tpu.memory_space<vmem>>, vector<16x128xf32>
    tpu.vector_store %arg2[%c0_4, %c0_5], %9 {strides = array<i32>} : memref<16x128xf32, #tpu.memory_space<vmem>>, vector<16x128xf32>,
    return
  }
  func.func @transform_0(%arg0: i32) -> (i32, i32) {
    %c0_i32 = arith.constant 0 : i32
    %c0_i32_0 = arith.constant 0 : i32
    return %arg0, %c0_i32 : i32, i32
  }
  func.func @transform_1(%arg0: i32) -> (i32, i32) {
    %c0_i32 = arith.constant 0 : i32
    %c0_i32_0 = arith.constant 0 : i32
    return %arg0, %c0_i32 : i32, i32
  }
}

</mosaic_0001>

<bundles_post_ra>
// kernel: tpu_custom_call.1
= control target key start
LH: loop header
LB: loop body
LE: loop exit
PB: predicated region body
PF: predicated region fallthrough
CT: control target
= control target key end

     0   :  { %6 = vsyncpa [#allocation3], 0  ;;  %s151_s0 = inlined_call_operand.hbm [shape: f32[16,128], index: 0, kind: input, shape index: {}]   ;;  %s152_s1 = inlined_call_operand.hbm [shape: f32[16,128], index: 1, kind: output, shape index: {}]  }
   0x1   :  { %7 = vsyncpa [#allocation4], 0  ;;  %s107_s6 = smov [#allocation2]   ;;  %s59_s10 = scalar_lea.hbm %s151_s0, 256 }
   0x2   :  { %s13_s7 = sshll.u32 %s107_s6, 4  ;;  %p60_p0 = scmp.ne.s32.totalorder %s151_s0, %s59_s10  ;;  %s14_s7 = int_to_ptr.vmem [resolvable:$true] %s13_s7 }
   0x3   :  { %p63_p1 = scmp.lt.u32.totalorder %s59_s10, %s151_s0 }
   0x5   :  { %p65_p2 = pnand %p63_p1, %p60_p0 }
   0x7   :  { %68 = shalt.err (!%p65_p2)
}
   0x8   :  { %s69_s15 = scalar_lea.vmem %s14_s7, 256  ;;  %p74_p4 = scmp.lt.s32.totalorder %s14_s7, %s14_s7 }
   0x9   :  { %p70_p3 = scmp.ne.s32.totalorder %s14_s7, %s69_s15  ;;  %p75_p5 = scmp.lt.s32.totalorder %s69_s15, %s69_s15 }
   0xb   :  { %p76_p6 = por %p75_p5, %p74_p4 }
   0xd   :  { %p77_p7 = pnand %p76_p6, %p70_p3 }
   0xf   :  { %80 = shalt.err (!%p77_p7)
}
  0x10   :  { %s108_s16 = smov 128   ;;  %s109_s17 = smov 8  }
  0x11   :  { %19 = dma.hbm_to_vmem [thread:$0]  %s151_s0, 256, %s14_s7, [#allocation3], %s108_s16, %s108_s16, %s109_s17  }
  0x12   :  { %103 = dma.done.wait [#allocation3], 256  }
  0x13   :  { %104 = vsyncadd [#allocation3], 4294967040  ;;  %v23_v0 = vld [vmem:[#allocation2] sm:$0xff]  ;;  %v24_v1 = vld [vmem:[#allocation2 + $0x8] sm:$0xff]  ;;  %s110_s20 = smov [#allocation5]  }
  0x14   :  { %v25_v2 = vadd.f32 3.0, %v23_v0  ;;  %v26_v3 = vadd.f32 3.0, %v24_v1  ;;  %s43_s21 = sshll.u32 %s110_s20, 4  ;;  %s44_s21 = int_to_ptr.vmem [resolvable:$true] %s43_s21 }
  0x15   :  { %s81_s0 = scalar_lea.vmem %s44_s21, 256  ;;  %p86_p9 = scmp.lt.s32.totalorder %s44_s21, %s44_s21 }
  0x16   :  { %v27_v4 = vmax.f32 %v25_v2, 0.0  ;;  %v28_v5 = vmax.f32 %v26_v3, 0.0  ;;  %p82_p8 = scmp.ne.s32.totalorder %s44_s21, %s81_s0  ;;  %p87_p10 = scmp.lt.s32.totalorder %s81_s0, %s81_s0 }
  0x18   :  { %v29_v6 = vmin.f32 %v27_v4, 6.0  ;;  %v30_v7 = vmin.f32 %v28_v5, 6.0  ;;  %p88_p11 = por %p87_p10, %p86_p9 }
  0x1a   :  { %v32_v8 = vmul.f32 0.16666667, %v29_v6  ;;  %v33_v9 = vmul.f32 0.16666667, %v30_v7  ;;  %p89_p12 = pnand %p88_p11, %p82_p8 }
  0x1c   :  { %v34_v10 = vmul.f32 %v32_v8, %v23_v0  ;;  %v35_v11 = vmul.f32 %v33_v9, %v24_v1 }
  0x1e   :  { %36 = vst [vmem:[#allocation5] sm:$0xff] %v34_v10  ;;  %37 = vst [vmem:[#allocation5 + $0x8] sm:$0xff] %v35_v11 }
  0x1f   :  { %92 = shalt.err (!%p89_p12)
}
  0x20   :  { %s93_s24 = scalar_lea.hbm %s152_s1, 256 }
  0x21   :  { %p94_p13 = scmp.ne.s32.totalorder %s152_s1, %s93_s24  ;;  %p97_p0 = scmp.lt.u32.totalorder %s93_s24, %s152_s1 }
  0x23   :  { %p99_p1 = pnand %p97_p0, %p94_p13 }
  0x25   :  { %102 = shalt.err (!%p99_p1)
}
  0x26   :  { %49 = dma.vmem_to_hbm [thread:$0]  %s44_s21, 256, %s152_s1, [#allocation4], %s108_s16, %s108_s16, %s109_s17  }
  0x27   :  { %105 = dma.done.wait [#allocation4], 256  }
  0x28   :  { %106 = vsyncadd [#allocation4], 4294967040 }
  0x29   :  { %53 = vsyncpa [#allocation3], 1 }
  0x2a   :  { %54 = vsyncpa [#allocation4], 1 }

</bundles_post_ra>
